<compile_context>
chip_gen: v6e
topology: v6e:2x2x1
jax: 0.10.0
libtpu: 0.0.40
codegen_flags: <defaults>
</compile_context>

<pallas_src>
import math

import jax
import jax.numpy as jnp
from jax.experimental import pallas as pl
from jax.experimental.pallas import tpu as pltpu


def _round_up(x: int, m: int) -> int:
    return (x + m - 1) // m * m


def _make_kernel(K, T, C_op, N_p, TN, n_tiles, separate_residual):
    """Kernel body for one (sample, output-node-tile) grid step."""

    def kernel(x_ref, thB_ref, lkT_ref, bias_ref, *rest):
        # x_ref    : (T, C_ip, N_p)        bf16   (C_ip == C_op unless C_in > C_out)
        # thB_ref  : (K, T, C_op, C_ip)    bf16   theta_k^T broadcast over time
        # lkT_ref  : (K*N_p, TN)           bf16   stacked Lk^T, node-tiled on columns
        # bias_ref : (T*C_op, 1)           f32
        # rest     : ([res_ref,] o_ref, ybuf_ref)
        if separate_residual:
            res_ref, o_ref, ybuf_ref = rest
        else:
            o_ref, ybuf_ref = rest

        j = pl.program_id(1)                       # output-node-tile index

        # ---- channel mix: compact theta, batched over time -----------------
        # Runs once per sample (node-tile 0); the full-node-width result lives
        # in the VMEM scratch and is reused for the remaining node tiles.
        @pl.when(j == 0)
        def _():
            x = x_ref[...]                                             # (T, C_ip, N_p)
            for k in range(K):                                         # static, small K
                # y_k[t, o, m] = sum_i theta[i, o, k] * x[b, i, t, m]
                yk = jnp.einsum('toi,tim->tom', thB_ref[k], x,
                                preferred_element_type=jnp.float32)    # (T, C_op, N_p)
                ybuf_ref[:, :, k * N_p:(k + 1) * N_p] = yk.astype(jnp.bfloat16)

        # ---- graph mix: single MXU contraction over (k, m) -----------------
        y = ybuf_ref[...].reshape(T * C_op, K * N_p)        # free merge (C_op % 16 == 0)
        acc = jnp.dot(y, lkT_ref[...],
                      preferred_element_type=jnp.float32)   # (T*C_op, TN) f32

        # ---- fused epilogue: bias + residual + ReLU (f32) -------------------
        if separate_residual:
            res = res_ref[...].astype(jnp.float32)
        else:
            if n_tiles == 1:
                xr = x_ref[...]
            else:
                start = pl.multiple_of(j * TN, TN)
                xr = x_ref[:, :, pl.ds(start, TN)]
            res = xr.reshape(T * C_op, TN).astype(jnp.float32)
        out = acc + bias_ref[...] + res
        o_ref[...] = jnp.maximum(out, 0.0).astype(o_ref.dtype)

    return kernel


def spatio_conv_layer(x, Lk, theta, bias, align_params=None):
    """Pallas TPU implementation of SpatioConvLayer.forward.

    x: (B, C_in, T, N), Lk: (K, N, N), theta: (C_in, C_out, K),
    bias: (1, C_out, 1, 1).  Returns (B, C_out, T, N) float32.
    """
    B, C_in, T, N = x.shape
    K = Lk.shape[0]
    C_out = theta.shape[1]
    separate_residual = C_in > C_out
    if separate_residual and align_params is None:
        raise ValueError("align_params (1x1 conv weight, bias) required when C_in > C_out")

    # ---- padding: nodes -> x128 lanes, channels -> x16 sublanes (bf16) -----
    N_p = _round_up(N, 128)
    C_op = _round_up(C_out, 16)
    C_ip = _round_up(C_in, 16) if separate_residual else C_op

    # ---- operands (bf16 for the MXU; accumulation / epilogue stay f32) -----
    xp = jnp.pad(x.astype(jnp.float32),
                 ((0, 0), (0, C_ip - C_in), (0, 0), (0, N_p - N)))
    x4 = jnp.transpose(xp, (0, 2, 1, 3)).astype(jnp.bfloat16)          # (B, T, C_ip, N_p)

    th = jnp.pad(theta.astype(jnp.float32),
                 ((0, C_ip - C_in), (0, C_op - C_out), (0, 0)))
    thT = jnp.transpose(th, (2, 1, 0))                                 # (K, C_op, C_ip)
    thB = jnp.broadcast_to(thT[:, None], (K, T, C_op, C_ip)).astype(jnp.bfloat16)

    lkp = jnp.pad(Lk.astype(jnp.float32), ((0, 0), (0, N_p - N), (0, N_p - N)))
    lkT = jnp.transpose(lkp, (0, 2, 1)).reshape(K * N_p, N_p).astype(jnp.bfloat16)

    b_rows = jnp.pad(bias.reshape(C_out).astype(jnp.float32), (0, C_op - C_out))
    b_rows = jnp.broadcast_to(b_rows[None, :], (T, C_op)).reshape(T * C_op, 1)

    args = [x4, thB, lkT, b_rows]

    if separate_residual:                        # Align: 1x1-conv residual (wrapper glue)
        w, b_al = align_params
        res = jnp.einsum('oi,bitn->botn', w[:, :, 0, 0], x) + b_al[None, :, None, None]
        res = jnp.pad(res.astype(jnp.float32),
                      ((0, 0), (0, C_op - C_out), (0, 0), (0, N_p - N)))
        res = jnp.transpose(res, (0, 2, 1, 3)).reshape(B, T * C_op, N_p).astype(jnp.bfloat16)
        args.append(res)
    # else: the residual is x itself (zero channel padding == F.pad semantics);
    # the kernel reads it from the x block already in VMEM — no second DMA.

    # ---- node-tile size + VMEM budget (per generation) ----------------------
    try:
        vmem_cap = int(pltpu.get_tpu_info().vmem_capacity_bytes)
    except Exception:
        vmem_cap = 64 * 1024 * 1024              # conservative (v7x per-TC VMEM)

    def est_vmem(tn):
        e = 2 * T * C_ip * N_p * 2               # x blocks (bf16, double-buffered)
        e += 2 * T * C_op * tn * 4               # out blocks (f32)
        if separate_residual:
            e += 2 * T * C_op * tn * 2           # residual blocks (bf16)
        e += 2 * K * N_p * tn * 2                # stacked Lk^T blocks (bf16)
        e += 2 * K * T * C_op * C_ip * 2         # theta (bf16, grid-invariant)
        e += 2 * T * C_op * 4                    # bias rows
        e += T * C_op * K * N_p * 2              # ybuf scratch (bf16)
        e += T * C_op * N_p * 4                  # f32 channel-mix intermediate
        return e + (4 << 20)                     # headroom

    budget = min((3 * vmem_cap) // 4, 96 * 1024 * 1024)
    TN = 128
    for tn in (N_p, 1024, 512, 256, 128):
        if tn <= N_p and N_p % tn == 0 and est_vmem(tn) <= budget:
            TN = tn
            break
    n_tiles = N_p // TN
    vmem_limit = int(max(16 << 20, min(est_vmem(TN), budget)))

    in_specs = [
        pl.BlockSpec((None, T, C_ip, N_p), lambda b, j: (b, 0, 0, 0)),
        pl.BlockSpec((K, T, C_op, C_ip), lambda b, j: (0, 0, 0, 0)),
        pl.BlockSpec((K * N_p, TN), lambda b, j: (0, j)),
        pl.BlockSpec((T * C_op, 1), lambda b, j: (0, 0)),
    ]
    if separate_residual:
        in_specs.append(pl.BlockSpec((None, T * C_op, TN), lambda b, j: (b, 0, j)))

    out2 = pl.pallas_call(
        _make_kernel(K, T, C_op, N_p, TN, n_tiles, separate_residual),
        out_shape=jax.ShapeDtypeStruct((B, T * C_op, N_p), jnp.float32),
        grid=(B, n_tiles),
        in_specs=in_specs,
        out_specs=pl.BlockSpec((None, T * C_op, TN), lambda b, j: (b, 0, j)),
        scratch_shapes=[pltpu.VMEM((T, C_op, K * N_p), jnp.bfloat16)],
        compiler_params=pltpu.CompilerParams(
            # Sample axis is parallel (megacore); the node-tile axis must stay
            # in-order on one core because the channel-mix scratch written at
            # tile 0 is reused by the remaining tiles of the same sample.
            dimension_semantics=("parallel", "arbitrary"),
            vmem_limit_bytes=vmem_limit),
    )(*args)

    out = out2.reshape(B, T, C_op, N_p)                      # free reshape
    out = jnp.transpose(out, (0, 2, 1, 3))[:, :C_out, :, :N] # back to NCHW, drop padding
    return out


def spatio_conv_ref(x, Lk, theta, bias, align_params=None):
    """Pure-JAX f32 reference reproducing the PyTorch forward exactly."""
    C_in, C_out = theta.shape[0], theta.shape[1]
    x_c = jnp.einsum('knm,bitm->bitkn', Lk, x)
    x_gc = jnp.einsum('iok,bitkn->botn', theta, x_c) + bias
    if C_in > C_out:
        w, b_al = align_params
        x_in = jnp.einsum('oi,bitn->botn', w[:, :, 0, 0], x) + b_al[None, :, None, None]
    elif C_in < C_out:
        x_in = jnp.pad(x, ((0, 0), (0, C_out - C_in), (0, 0), (0, 0)))
    else:
        x_in = x
    return jnp.maximum(x_gc + x_in, 0.0)


if __name__ == "__main__":
    def q(a):  # bf16-quantize (kernel feeds bf16 operands to the MXU)
        return a.astype(jnp.bfloat16).astype(jnp.float32)

    def run_case(name, B, C_in, C_out, T, N, K, key):
        k1, k2, k3, k4, k5, k6 = jax.random.split(key, 6)
        x = jax.random.normal(k1, (B, C_in, T, N), dtype=jnp.float32)
        Lk = jax.random.normal(k2, (K, N, N), dtype=jnp.float32) / math.sqrt(N)
        # reset_parameters(): kaiming_uniform_(theta, a=sqrt(5)); fan_in = C_out*K
        fan_in = C_out * K
        gain = math.sqrt(2.0 / (1.0 + 5.0))
        t_bound = gain * math.sqrt(3.0 / fan_in)
        theta = jax.random.uniform(k3, (C_in, C_out, K), jnp.float32,
                                   minval=-t_bound, maxval=t_bound)
        b_bound = 1.0 / math.sqrt(fan_in)
        bias = jax.random.uniform(k4, (1, C_out, 1, 1), jnp.float32,
                                  minval=-b_bound, maxval=b_bound)
        align_params = None
        if C_in > C_out:
            w_bound = 1.0 / math.sqrt(C_in)
            w = jax.random.uniform(k5, (C_out, C_in, 1, 1), jnp.float32,
                                   minval=-w_bound, maxval=w_bound)
            b_al = jax.random.uniform(k6, (C_out,), jnp.float32,
                                      minval=-w_bound, maxval=w_bound)
            align_params = (q(w), q(b_al))

        xq, Lkq, thq = q(x), q(Lk), q(theta)
        out = spatio_conv_layer(xq, Lkq, thq, bias, align_params)
        out = jax.block_until_ready(out)
        ref = spatio_conv_ref(xq, Lkq, thq, bias, align_params)
        assert out.shape == (B, C_out, T, N), (name, out.shape)
        err = float(jnp.max(jnp.abs(out - ref)))
        # bf16 MXU operands + bf16 intermediate staging; accumulation is f32.
        assert jnp.allclose(out, ref, atol=3e-2, rtol=3e-2), (name, err)
        return err

    key = jax.random.PRNGKey(0)
    ks = jax.random.split(key, 3)
    run_case("same_channels", B=2, C_in=4, C_out=4, T=8, N=16, K=3, key=ks[0])
    run_case("pad_channels", B=2, C_in=2, C_out=4, T=8, N=16, K=3, key=ks[1])
    run_case("conv_align", B=2, C_in=6, C_out=4, T=8, N=16, K=3, key=ks[2])
    print("KERNEL_OK")
</pallas_src>

<mosaic_0001>
module attributes {stable_mosaic.version = 11 : i64} {
  func.func @kernel(%arg0: i32, %arg1: i32, %arg2: memref<1x8x16x128xbf16, #tpu.memory_space<vmem>>, %arg3: memref<3x8x16x16xbf16, #tpu.memory_space<vmem>>, %arg4: memref<384x128xbf16, #tpu.memory_space<vmem>>, %arg5: memref<128x1xf32, #tpu.memory_space<vmem>>, %arg6: memref<1x128x128xf32, #tpu.memory_space<vmem>>, %arg7: memref<8x16x384xbf16, #tpu.memory_space<vmem>>) attributes {dimension_semantics = [#tpu.dimension_semantics<parallel>, #tpu.dimension_semantics<arbitrary>], iteration_bounds = array<i64: 2, 1>, scalar_prefetch = 0 : i64, scratch_operands = 1 : i64, tpu.core_type = #tpu.core_type<tc>, window_params = [{transform_indices = @transform_0, window_bounds = array<i64: 1, 8, 16, 128>}, {pipeline_mode = #tpu.pipeline_mode<synchronous>, transform_indices = @transform_1, window_bounds = array<i64: 3, 8, 16, 16>}, {transform_indices = @transform_2, window_bounds = array<i64: 384, 128>}, {pipeline_mode = #tpu.pipeline_mode<synchronous>, transform_indices = @transform_3, window_bounds = array<i64: 128, 1>}, {transform_indices = @transform_4, window_bounds = array<i64: 1, 128, 128>}]} {
    %c0_i32 = arith.constant 0 : i32
    %0 = arith.cmpi eq, %arg1, %c0_i32 : i32
    %1 = arith.extui %0 : i1 to i32
    %c0_i32_0 = arith.constant 0 : i32
    %2 = arith.cmpi ne, %1, %c0_i32_0 : i32
    scf.if %2 {
      %c0_15 = arith.constant 0 : index
      %c0_16 = arith.constant 0 : index
      %c0_17 = arith.constant 0 : index
      %c0_18 = arith.constant 0 : index
      %20 = vector.load %arg2[%c0_15, %c0_16, %c0_17, %c0_18] : memref<1x8x16x128xbf16, #tpu.memory_space<vmem>>, vector<1x8x16x128xbf16>
      %21 = vector.shape_cast %20 : vector<1x8x16x128xbf16> to vector<8x16x128xbf16>
      %c0_19 = arith.constant 0 : index
      %c0_20 = arith.constant 0 : index
      %c0_21 = arith.constant 0 : index
      %c0_22 = arith.constant 0 : index
      %22 = vector.load %arg3[%c0_19, %c0_20, %c0_21, %c0_22] : memref<3x8x16x16xbf16, #tpu.memory_space<vmem>>, vector<1x8x16x16xbf16>
      %23 = vector.shape_cast %22 : vector<1x8x16x16xbf16> to vector<8x16x16xbf16>
      "tpu.trace_start"() <{level = 10 : i32, message = "toi,tim->tom"}> : () -> ()
      %cst_23 = arith.constant dense<0.000000e+00> : vector<8x16x128xf32>
      %24 = tpu.matmul %23, %21, %cst_23 {dimension_numbers = #tpu.dot_dimension_numbers<[2], [1], [1], [2], [0, 0, 0, 1, 1, 2], [0], [0]>} : vector<8x16x16xbf16>, vector<8x16x128xbf16>, vector<8x16x128xf32> -> vector<8x16x128xf32>
      "tpu.trace_stop"() : () -> ()
      %25 = arith.truncf %24 : vector<8x16x128xf32> to vector<8x16x128xbf16>
      %c0_24 = arith.constant 0 : index
      %c0_25 = arith.constant 0 : index
      %c0_26 = arith.constant 0 : index
      %26 = vector.load %arg7[%c0_24, %c0_25, %c0_26] : memref<8x16x384xbf16, #tpu.memory_space<vmem>>, vector<8x16x128xbf16>
      tpu.vector_store %arg7[%c0_24, %c0_25, %c0_26], %25 {strides = array<i32>} : memref<8x16x384xbf16, #tpu.memory_space<vmem>>, vector<8x16x128xbf16>,
      %c1 = arith.constant 1 : index
      %c0_27 = arith.constant 0 : index
      %c0_28 = arith.constant 0 : index
      %c0_29 = arith.constant 0 : index
      %27 = vector.load %arg3[%c1, %c0_27, %c0_28, %c0_29] : memref<3x8x16x16xbf16, #tpu.memory_space<vmem>>, vector<1x8x16x16xbf16>
      %28 = vector.shape_cast %27 : vector<1x8x16x16xbf16> to vector<8x16x16xbf16>
      "tpu.trace_start"() <{level = 10 : i32, message = "toi,tim->tom"}> : () -> ()
      %cst_30 = arith.constant dense<0.000000e+00> : vector<8x16x128xf32>
      %29 = tpu.matmul %28, %21, %cst_30 {dimension_numbers = #tpu.dot_dimension_numbers<[2], [1], [1], [2], [0, 0, 0, 1, 1, 2], [0], [0]>} : vector<8x16x16xbf16>, vector<8x16x128xbf16>, vector<8x16x128xf32> -> vector<8x16x128xf32>
      "tpu.trace_stop"() : () -> ()
      %30 = arith.truncf %29 : vector<8x16x128xf32> to vector<8x16x128xbf16>
      %c0_31 = arith.constant 0 : index
      %c0_32 = arith.constant 0 : index
      %c128 = arith.constant 128 : index
      %31 = vector.load %arg7[%c0_31, %c0_32, %c128] : memref<8x16x384xbf16, #tpu.memory_space<vmem>>, vector<8x16x128xbf16>
      tpu.vector_store %arg7[%c0_31, %c0_32, %c128], %30 {strides = array<i32>} : memref<8x16x384xbf16, #tpu.memory_space<vmem>>, vector<8x16x128xbf16>,
      %c2 = arith.constant 2 : index
      %c0_33 = arith.constant 0 : index
      %c0_34 = arith.constant 0 : index
      %c0_35 = arith.constant 0 : index
      %32 = vector.load %arg3[%c2, %c0_33, %c0_34, %c0_35] : memref<3x8x16x16xbf16, #tpu.memory_space<vmem>>, vector<1x8x16x16xbf16>
      %33 = vector.shape_cast %32 : vector<1x8x16x16xbf16> to vector<8x16x16xbf16>
      "tpu.trace_start"() <{level = 10 : i32, message = "toi,tim->tom"}> : () -> ()
      %cst_36 = arith.constant dense<0.000000e+00> : vector<8x16x128xf32>
      %34 = tpu.matmul %33, %21, %cst_36 {dimension_numbers = #tpu.dot_dimension_numbers<[2], [1], [1], [2], [0, 0, 0, 1, 1, 2], [0], [0]>} : vector<8x16x16xbf16>, vector<8x16x128xbf16>, vector<8x16x128xf32> -> vector<8x16x128xf32>
      "tpu.trace_stop"() : () -> ()
      %35 = arith.truncf %34 : vector<8x16x128xf32> to vector<8x16x128xbf16>
      %c0_37 = arith.constant 0 : index
      %c0_38 = arith.constant 0 : index
      %c256 = arith.constant 256 : index
      %36 = vector.load %arg7[%c0_37, %c0_38, %c256] : memref<8x16x384xbf16, #tpu.memory_space<vmem>>, vector<8x16x128xbf16>
      tpu.vector_store %arg7[%c0_37, %c0_38, %c256], %35 {strides = array<i32>} : memref<8x16x384xbf16, #tpu.memory_space<vmem>>, vector<8x16x128xbf16>,
    } else {
    }
    %c0 = arith.constant 0 : index
    %c0_1 = arith.constant 0 : index
    %c0_2 = arith.constant 0 : index
    %3 = vector.load %arg7[%c0, %c0_1, %c0_2] : memref<8x16x384xbf16, #tpu.memory_space<vmem>>, vector<8x16x384xbf16>
    %4 = vector.shape_cast %3 : vector<8x16x384xbf16> to vector<128x384xbf16>
    %c0_3 = arith.constant 0 : index
    %c0_4 = arith.constant 0 : index
    %5 = vector.load %arg4[%c0_3, %c0_4] : memref<384x128xbf16, #tpu.memory_space<vmem>>, vector<384x128xbf16>
    %cst = arith.constant dense<0.000000e+00> : vector<128x128xf32>
    %6 = tpu.matmul %4, %5, %cst {dimension_numbers = #tpu.dot_dimension_numbers<[1], [0], [0], [1], [0, 0, 1, 1], [], []>} : vector<128x384xbf16>, vector<384x128xbf16>, vector<128x128xf32> -> vector<128x128xf32>
    %c0_5 = arith.constant 0 : index
    %c0_6 = arith.constant 0 : index
    %c0_7 = arith.constant 0 : index
    %c0_8 = arith.constant 0 : index
    %7 = vector.load %arg2[%c0_5, %c0_6, %c0_7, %c0_8] : memref<1x8x16x128xbf16, #tpu.memory_space<vmem>>, vector<1x8x16x128xbf16>
    %8 = vector.shape_cast %7 : vector<1x8x16x128xbf16> to vector<8x16x128xbf16>
    %9 = vector.shape_cast %8 : vector<8x16x128xbf16> to vector<128x128xbf16>
    %10 = arith.extf %9 : vector<128x128xbf16> to vector<128x128xf32>
    %c0_9 = arith.constant 0 : index
    %c0_10 = arith.constant 0 : index
    %11 = vector.load %arg5[%c0_9, %c0_10] : memref<128x1xf32, #tpu.memory_space<vmem>>, vector<128x1xf32>
    %12 = vector.broadcast %11 : vector<128x1xf32> to vector<128x128xf32>
    %13 = arith.addf %6, %12 : vector<128x128xf32>
    %14 = arith.addf %13, %10 : vector<128x128xf32>
    %cst_11 = arith.constant 0.000000e+00 : f32
    %15 = vector.broadcast %cst_11 : f32 to vector<128x128xf32>
    %16 = arith.maximumf %14, %15 : vector<128x128xf32>
    %c0_12 = arith.constant 0 : index
    %c0_13 = arith.constant 0 : index
    %c0_14 = arith.constant 0 : index
    %17 = vector.load %arg6[%c0_12, %c0_13, %c0_14] : memref<1x128x128xf32, #tpu.memory_space<vmem>>, vector<1x128x128xf32>
    %18 = vector.shape_cast %17 : vector<1x128x128xf32> to vector<128x128xf32>
    %19 = vector.shape_cast %16 : vector<128x128xf32> to vector<1x128x128xf32>
    tpu.vector_store %arg6[%c0_12, %c0_13, %c0_14], %19 {strides = array<i32>} : memref<1x128x128xf32, #tpu.memory_space<vmem>>, vector<1x128x128xf32>,
    return
  }
  func.func @transform_0(%arg0: i32, %arg1: i32) -> (i32, i32, i32, i32) {
    %c0_i32 = arith.constant 0 : i32
    %c0_i32_0 = arith.constant 0 : i32
    %c0_i32_1 = arith.constant 0 : i32
    %c0_i32_2 = arith.constant 0 : i32
    return %arg0, %c0_i32, %c0_i32_0, %c0_i32_1 : i32, i32, i32, i32
  }
  func.func @transform_1(%arg0: i32, %arg1: i32) -> (i32, i32, i32, i32) {
    %c0_i32 = arith.constant 0 : i32
    %c0_i32_0 = arith.constant 0 : i32
    %c0_i32_1 = arith.constant 0 : i32
    %c0_i32_2 = arith.constant 0 : i32
    %c0_i32_3 = arith.constant 0 : i32
    return %c0_i32, %c0_i32_0, %c0_i32_1, %c0_i32_2 : i32, i32, i32, i32
  }
  func.func @transform_2(%arg0: i32, %arg1: i32) -> (i32, i32) {
    %c0_i32 = arith.constant 0 : i32
    %c0_i32_0 = arith.constant 0 : i32
    return %c0_i32, %arg1 : i32, i32
  }
  func.func @transform_3(%arg0: i32, %arg1: i32) -> (i32, i32) {
    %c0_i32 = arith.constant 0 : i32
    %c0_i32_0 = arith.constant 0 : i32
    %c0_i32_1 = arith.constant 0 : i32
    return %c0_i32, %c0_i32_0 : i32, i32
  }
  func.func @transform_4(%arg0: i32, %arg1: i32) -> (i32, i32, i32) {
    %c0_i32 = arith.constant 0 : i32
    %c0_i32_0 = arith.constant 0 : i32
    return %arg0, %c0_i32, %arg1 : i32, i32, i32
  }
}

</mosaic_0001>

<bundles_post_ra>
// kernel: tpu_custom_call.1
= control target key start
LH: loop header
LB: loop body
LE: loop exit
PB: predicated region body
PF: predicated region fallthrough
CT: control target
= control target key end

     0   :  { %9 = vsyncpa [#allocation4], 0  ;;  %s3922_s0 = inlined_call_operand.vmem [shape: bf16[2,8,16,128], index: 0, kind: input, shape index: {}]   ;;  %s3923_s1 = inlined_call_operand.hbm [shape: bf16[3,8,16,16], index: 1, kind: input, shape index: {}]   ;;  %s3924_s2 = inlined_call_operand.hbm [shape: bf16[384,128], index: 2, kind: input, shape index: {}]   ;;  %s3925_s3 = inlined_call_operand.vmem [shape: f32[128,1], index: 3, kind: input, shape index: {}]   ;;  %s3926_s4 = inlined_call_operand.hbm [shape: f32[2,128,128], index: 4, kind: output, shape index: {}]  }
   0x1   :  { %10 = vsyncpa [#allocation7], 0 }
   0x2   :  { %11 = vsyncpa [#allocation5], 0 }
   0x3   :  { %13 = vsyncpa [#allocation5 + $0x1], 0  ;;  %s3520_s15 = smov 0   ;;  %s3522_s16 = smov 0  }
   0x4   :  { %s3524_s17 = smov 0   ;;  %s3526_s18 = smov 0  }
   0x5   :  { %s3528_s19 = smov 0   ;;  %s3530_s20 = smov 0  }
   0x6 LB: > { %s2616_s21 = sadd.s32 4294967295, %s3483_s20   ;;  %s2617_s22 = sadd.s32 4294967294, %s3483_s20   ;;  %s3483_s20 = sphi %s3530_s20, %s19_s20   ;;  %s3479_s19 = sphi %s3528_s19, %s3939_s19   ;;  %s3475_s18 = sphi %s3526_s18, %s3938_s18   ;;  %s3471_s17 = sphi %s3524_s17, %s3937_s17   ;;  %s3467_s16 = sphi %s3522_s16, %s3936_s16   ;;  %s3463_s15 = sphi %s3520_s15, %s3935_s15  }
   0x7   : > { %s31_s23 = sadd.s32 1, %s3479_s19  ;;  %s134_s24 = sadd.s32 1, %s3471_s17 }
   0x8   : > { %p33_p0 = scmp.ge.s32.totalorder %s31_s23, 2  ;;  %p144_p1 = scmp.ne.s32.totalorder %s3471_s17, %s3467_s16 }
   0x9   : > { %p145_p2 = scmp.eq.s32.totalorder %s2616_s21, 1  ;;  %p150_p3 = scmp.ne.s32.totalorder %s3467_s16, %s3463_s15 }
   0xa   : > { %s3941_s23 = smov (%p33_p0, %s31_s23), 0  ;;  %p151_p5 = scmp.eq.s32.totalorder %s2617_s22, 1 }
   0xb   : > { %p3560_p4 = por %p145_p2, %p144_p1  ;;  %s129_s26 = ssub.s32 %s3479_s19, %s3941_s23 }
   0xc   : > { %p2618_p6 = scmp.ge.s32.totalorder %s3483_s20, 1  ;;  %p132_p7 = scmp.eq.s32.totalorder %s129_s26, 0 }
   0xd   : > { %s3928_s25 = scalar_select %p3560_p4, 1, 0 }
   0xe   : > { %p3567_p8 = por %p151_p5, %p150_p3  ;;  %p158_p9 = scmp.lt.s32.totalorder %s3483_s20, 3 }
   0xf   : > { %s3573_s28 = scalar_select %p132_p7, %s3471_s17, %s134_s24  }
  0x10   : > { %s3929_s27 = scalar_select %p3567_p8, 1, 0 }
  0x11   : > { %p3575_p10 = pnand %p2618_p6, %p158_p9  ;;  %p3579_p11 = scmp.eq.s32.totalorder %s2616_s21, 0 }
  0x12   : > { %s3485_s5 = smov [#allocation3]   ;;  %s3486_s8 = smov [#allocation6]  }
  0x13   : > { %p3188_p12 = pneg %p3575_p10  ;;  %s170_s6 = sshll.u32 %s3485_s5, 4  ;;  %s171_s6 = int_to_ptr.vmem [resolvable:$true] %s170_s6 }
  0x14   : > { %s185_s9 = sshll.u32 %s3486_s8, 4  ;;  %s3358_s10 = scalar_lea.vmem %s171_s6, 3072  ;;  %s186_s9 = int_to_ptr.vmem [resolvable:$true] %s185_s9 }
  0x15   : > { %p3587_p13 = pnand %p3579_p11, %p3188_p12  ;;  %p3359_p1 = scmp.ne.s32.totalorder %s171_s6, %s3358_s10 }
  0x16   : > { %p3366_p5 = scmp.lt.s32.totalorder %s171_s6, %s171_s6  ;;  %p3367_p6 = scmp.lt.s32.totalorder %s3358_s10, %s3358_s10 }
  0x17   : > { %p3349_p0 = pneg %p3587_p13 }
  0x18   : > { %p3368_p7 = por %p3367_p6, %p3366_p5 }
  0x19   : > { %p3361_p2 = pnand %p3359_p1, %p3349_p0 }
  0x1b   : > { %p3362_p3 = pneg %p3361_p2 }
  0x1d   : > { %p3369_p9 = pnand %p3368_p7, %p3362_p3 }
  0x1f   : > { %3372 = shalt.err (!%p3369_p9)
}
  0x20   : > { %s3487_s11 = smov 64   ;;  %s3488_s12 = smov 4  }
  0x21   : > { %3191 = dma.hbm_to_vmem [thread:$0]  (!%p3587_p13), %s3923_s1, 3072, %s171_s6, [#allocation4], %s3487_s11, %s3487_s11, %s3488_s12  }
  0x22   : > { %s3384_s21 = scalar_lea.vmem %s186_s9, 3072  ;;  %p3392_p8 = scmp.lt.s32.totalorder %s186_s9, %s186_s9 }
  0x23   : > { %p3385_p12 = scmp.ne.s32.totalorder %s186_s9, %s3384_s21  ;;  %p3393_p4 = scmp.lt.s32.totalorder %s3384_s21, %s3384_s21 }
  0x25   : > { %p3387_p1 = pnand %p3385_p12, %p3349_p0  ;;  %p3394_p5 = por %p3393_p4, %p3392_p8 }
  0x27   : > { %p3388_p2 = pneg %p3387_p1 }
  0x29   : > { %p3395_p3 = pnand %p3394_p5, %p3388_p2 }
  0x2b   : > { %3398 = shalt.err (!%p3395_p3)
}
  0x2c   : > { %3194 = dma.hbm_to_vmem [thread:$0]  (!%p3587_p13), %s3924_s2, 3072, %s186_s9, [#allocation7], %s3487_s11, %s3487_s11, %s3488_s12  }
  0x2d   : > { %212 = sbr.rel (%p3575_p10) target bundleno = 593 (0x251), region = 36 }
  0x32   : > { %3450 = dma.done.wait (%p3579_p11), [#allocation4], 3072  }
  0x33   : > { %3452 = vsyncadd (%p3579_p11), [#allocation4], 4294964224 }
  0x34   : > { %3454 = dma.done.wait (%p3579_p11), [#allocation7], 3072  }
  0x35   : > { %3456 = vsyncadd (%p3579_p11), [#allocation7], 4294964224  ;;  %p242_p4 = scmp.lt.s32.totalorder %s3475_s18, 1  ;;  %v3489_v0 = vmov 0.0   ;;  %vm3490_vm0 = vmmov 0   ;;  %v3265_v3 = vld [vmem:[#allocation3] sm:$0xff]  }
  0x36   : > { %3002 = vmatprep.subr.bf16.mxu1 %v3489_v0  ;;  %3026 = vmatprep.subr.bf16.mxu0 %v3489_v0  ;;  %vm295_vm1 = vcmask 130048   ;;  %v3266_v4 = vld [vmem:[#allocation3 + $0x20] sm:$0xff]   ;;  %v3269_v7 = vld [vmem:[#allocation3 + $0x8] sm:$0xff]   ;;  %v3270_v8 = vld [vmem:[#allocation3 + $0x30] sm:$0xff]   ;;  %v3491_v57 = vmov 0   ;;  %s239_s9 = sand.u32 1, %s3467_s16  }
  0x37   : > { %s243_s26 = scalar_select %p242_p4, %s3475_s18, 1  ;;  %3004 = vmatprep.mubr.msk.bf16.mxu1 %vm3490_vm0, %v3489_v0  ;;  %3028 = vmatprep.mubr.msk.bf16.mxu0 %vm3490_vm0, %v3489_v0  ;;  %v3272_v10 = vld [vmem:[#allocation3 + $0x10] sm:$0xff]   ;;  %v3273_v11 = vld [vmem:[#allocation3 + $0x40] sm:$0xff]   ;;  %v3275_v13 = vld [vmem:[#allocation3 + $0x18] sm:$0xff]  }
  0x38   : > { %v3276_v14 = vld [vmem:[#allocation3 + $0x50] sm:$0xff]   ;;  %v3278_v16 = vld [vmem:[#allocation3 + $0x28] sm:$0xff]   ;;  %v3279_v17 = vld [vmem:[#allocation3 + $0x60] sm:$0xff]   ;;  %3261 = vset.pattern.permute.xlu0 %v3491_v57  ;;  %3262 = vset.pattern.permute.xlu1 %v3491_v57  ;;  %s2625_s10 = sshll.u32 %s239_s9, 7  ;;  %s3877_s22 = scalar_lea.sflag [#allocation5], %s239_s9 }
  0x39   : > { %s2785_s29 = sshll.u32 %s243_s26, 6  ;;  %v3281_v19 = vld [vmem:[#allocation3 + $0x38] sm:$0xff]   ;;  %v3282_v20 = vld [vmem:[#allocation3 + $0x70] sm:$0xff]   ;;  %v3283_v21 = vld [vmem:[#allocation3 + $0x48] sm:$0xff]   ;;  %s3836_s11 = scalar_lea.vmem [#allocation8], %s2625_s10 }
  0x3a   : > { %s3630_s6 = scalar_lea.vmem %s3922_s0, %s2785_s29  ;;  %v3287_v22 = vld [vmem:[#allocation3 + $0x80] sm:$0xff]   ;;  %v3284_v23 = vld [vmem:[#allocation3 + $0x58] sm:$0xff]   ;;  %v3289_v24 = vld [vmem:[#allocation3 + $0x90] sm:$0xff]   ;;  %s2520_s12 = sshll.u32 %s3836_s11, 4  ;;  %s3871_s12 = int_to_ptr.vmem [resolvable:$true] %s2520_s12 }
  0x3b   : > { %v3633_v1 = vld [vmem:[%s3630_s6] sm:$0xff]   ;;  %v3642_v5 = vld [vmem:[%s3630_s6 + $0x8] sm:$0xff]   ;;  %v3647_v6 = vld [vmem:[%s3630_s6 + $0x30] sm:$0xff]   ;;  %p3933_p10 = scmp.ne.s32.totalorder %s3928_s25, 0  ;;  %s3492_s24 = smov [#allocation8]  }
  0x3c   : > { %v3636_v2 = vld [vmem:[%s3630_s6 + $0x20] sm:$0xff]   ;;  %3003 = vmatpush3.bf16.msra.mxu1 %v3633_v1  ;;  %v3271_v9 = vld [vmem:[%s3630_s6 + $0x10] sm:$0xff]   ;;  %v3669_v12 = vld [vmem:[%s3630_s6 + $0x18] sm:$0xff]   ;;  %s3403_s26 = sshll.u32 %s3492_s24, 4  ;;  %s3404_s26 = int_to_ptr.vmem [resolvable:$false] %s3403_s26 }
  0x3d   : > { %3027 = vmatpush3.bf16.msra.mxu0 %v3636_v2  ;;  %3008 = vmatprep.subr.bf16.mxu1 %v3489_v0  ;;  %v3681_v15 = vld [vmem:[%s3630_s6 + $0x28] sm:$0xff]   ;;  %v3693_v18 = vld [vmem:[%s3630_s6 + $0x38] sm:$0xff]   ;;  %v3291_v26 = vld [vmem:[#allocation3 + $0xa0] sm:$0xff]   ;;  %s3405_s29 = scalar_lea.vmem %s3404_s26, 4096  ;;  %p3406_p0 = scmp.lt.s32.totalorder %s3871_s12, %s3404_s26 }
  0x3e   : > { %3038 = vmatprep.subr.bf16.mxu0 %v3489_v0  ;;  %v3285_v25 = vld [vmem:[#allocation3 + $0x68] sm:$0xff]   ;;  %v3295_v27 = vld [vmem:[#allocation6 + $0x78] sm:$0xff]   ;;  %v3293_v29 = vld [vmem:[#allocation3 + $0xb0] sm:$0xff]  }
  0x3f   : > { %3005 = vmatmul.mubr.msk.bf16.vlgmr.msra.gmra.mxu1 %vm295_vm1, %v3265_v3  ;;  %v3286_v28 = vld [vmem:[#allocation3 + $0x78] sm:$0xff]   ;;  %v3297_v31 = vld [vmem:[#allocation6 + $0x70] sm:$0xff]   ;;  %v3288_v33 = vld [vmem:[#allocation3 + $0x88] sm:$0xff]  }
  0x40   : > { %3029 = vmatmul.mubr.msk.bf16.vlgmr.msra.gmra.mxu0 %vm295_vm1, %v3266_v4  ;;  %3009 = vmatpush3.bf16.msra.mxu1 %v3642_v5  ;;  %v3296_v30 = vld [vmem:[#allocation6 + $0x38] sm:$0xff]   ;;  %v3298_v32 = vld [vmem:[#allocation6 + $0x30] sm:$0xff]   ;;  %v3299_v34 = vld [vmem:[#allocation6 + $0x68] sm:$0xff]  }
  0x41   : > { %3039 = vmatpush3.bf16.msra.mxu0 %v3647_v6  ;;  %3010 = vmatprep.mubr.msk.bf16.mxu1 %vm3490_vm0, %v3489_v0  ;;  %v3300_v35 = vld [vmem:[#allocation6 + $0x28] sm:$0xff]   ;;  %v3301_v36 = vld [vmem:[#allocation6 + $0x60] sm:$0xff]   ;;  %v3290_v38 = vld [vmem:[#allocation3 + $0x98] sm:$0xff]  }
  0x42   : > { %3040 = vmatprep.mubr.msk.bf16.mxu0 %vm3490_vm0, %v3489_v0  ;;  %3014 = vmatprep.subr.bf16.mxu1 %v3489_v0  ;;  %v3302_v37 = vld [vmem:[#allocation6 + $0x20] sm:$0xff]   ;;  %v3303_v39 = vld [vmem:[#allocation6 + $0x58] sm:$0xff]   ;;  %v3305_v41 = vld [vmem:[#allocation6 + $0x50] sm:$0xff]  }
  0x43   : > { %3050 = vmatprep.subr.bf16.mxu0 %v3489_v0  ;;  %v3304_v40 = vld [vmem:[#allocation6 + $0x18] sm:$0xff]   ;;  %v3306_v42 = vld [vmem:[#allocation6 + $0x10] sm:$0xff]   ;;  %v3292_v43 = vld [vmem:[#allocation3 + $0xa8] sm:$0xff]  }
  0x44   : > { %v3307_v44 = vld [vmem:[#allocation6 + $0x48] sm:$0xff]   ;;  %v3309_v46 = vld [vmem:[#allocation6 + $0x40] sm:$0xff]   ;;  %v3294_v48 = vld [vmem:[#allocation3 + $0xb8] sm:$0xff]  }
  0x45   : > { %v3308_v45 = vld [vmem:[#allocation6 + $0x8] sm:$0xff]   ;;  %v3310_v47 = vld [vmem:[#allocation6] sm:$0xff]   ;;  %v3316_v49 = vld [vmem:[#allocation6 + $0xb8] sm:$0xff]  }
  0x46   : > { %v3320_v50 = vld [vmem:[#allocation6 + $0xb0] sm:$0xff]   ;;  %v3321_v51 = vld [vmem:[#allocation6 + $0xa8] sm:$0xff]   ;;  %v3325_v52 = vld [vmem:[#allocation6 + $0xa0] sm:$0xff]  }
  0x47   : > { %3011 = vmatmul.mubr.msk.bf16.vlgmr.msra.gmra.mxu1 %vm295_vm1, %v3269_v7  ;;  %v3326_v53 = vld [vmem:[#allocation6 + $0x98] sm:$0xff]   ;;  %v3330_v54 = vld [vmem:[#allocation6 + $0x90] sm:$0xff]   ;;  %v3331_v55 = vld [vmem:[#allocation6 + $0x88] sm:$0xff]  }
  0x48   : > { %3041 = vmatmul.mubr.msk.bf16.vlgmr.msra.gmra.mxu0 %vm295_vm1, %v3270_v8  ;;  %3015 = vmatpush3.bf16.msra.mxu1 %v3271_v9  ;;  %v3334_v56 = vld [vmem:[#allocation6 + $0x80] sm:$0xff]   ;;  %v1896_v59 = vld [vmem:[%s3925_s3 + $0x8] sm:$0xff]  ;;  %v1897_v60 = vld [vmem:[%s3925_s3 + $0x10] sm:$0xff] }
  0x49   : > { %3051 = vmatpush3.bf16.msra.mxu0 %v3633_v1  ;;  %3016 = vmatprep.mubr.msk.bf16.mxu1 %vm3490_vm0, %v3489_v0  ;;  %v1895_v58 = vld [vmem:[%s3925_s3] sm:$0xff]  ;;  %v1898_v62 = vld [vmem:[%s3925_s3 + $0x18] sm:$0xff]  ;;  %v1901_v63 = vld [vmem:[%s3925_s3 + $0x30] sm:$0xff] }
  0x4a   : > { %3052 = vmatprep.mubr.msk.bf16.mxu0 %vm3490_vm0, %v3489_v0  ;;  %3020 = vmatprep.subr.bf16.mxu1 %v3489_v0  ;;  %v1899_v61 = vld [vmem:[%s3925_s3 + $0x20] sm:$0xff]  ;;  %v1902_v7 = vld [vmem:[%s3925_s3 + $0x38] sm:$0xff] }
  0x4b   : > { %3062 = vmatprep.subr.bf16.mxu0 %v3489_v0  ;;  %1913 = vperm.xlu0 %3261, %v1895_v58  }
  0x4c   : > { %1923 = vperm.xlu1 %3262, %v1897_v60  }
  0x4f   : > { %3017 = vmatmul.mubr.msk.bf16.vlgmr.msra.gmra.mxu1 %vm295_vm1, %v3272_v10  ;;  %1918 = vperm.xlu0 %3261, %v1896_v59  }
  0x50   : > { %3053 = vmatmul.mubr.msk.bf16.vlgmr.msra.gmra.mxu0 %vm295_vm1, %v3273_v11  ;;  %3021 = vmatpush3.bf16.msra.mxu1 %v3669_v12 }
  0x51   : > { %3063 = vmatpush3.bf16.msra.mxu0 %v3271_v9  ;;  %3022 = vmatprep.mubr.msk.bf16.mxu1 %vm3490_vm0, %v3489_v0 }
  0x52   : > { %3064 = vmatprep.mubr.msk.bf16.mxu0 %vm3490_vm0, %v3489_v0  ;;  %3032 = vmatprep.subr.bf16.mxu1 %v3489_v0 }
  0x53   : > { %3074 = vmatprep.subr.bf16.mxu0 %v3489_v0  ;;  %1933 = vperm.xlu0 %3261, %v1899_v61  }
  0x54   : > { %1928 = vperm.xlu1 %3262, %v1898_v62  }
  0x57   : > { %3023 = vmatmul.mubr.msk.bf16.vlgmr.msra.gmra.mxu1 %vm295_vm1, %v3275_v13  ;;  %1943 = vperm.xlu0 %3261, %v1901_v63  }
  0x58   : > { %3065 = vmatmul.mubr.msk.bf16.vlgmr.msra.gmra.mxu0 %vm295_vm1, %v3276_v14  ;;  %3033 = vmatpush3.bf16.msra.mxu1 %v3681_v15 }
  0x59   : > { %3075 = vmatpush3.bf16.msra.mxu0 %v3636_v2  ;;  %3034 = vmatprep.mubr.msk.bf16.mxu1 %vm3490_vm0, %v3489_v0 }
  0x5a   : > { %3076 = vmatprep.mubr.msk.bf16.mxu0 %vm3490_vm0, %v3489_v0  ;;  %3044 = vmatprep.subr.bf16.mxu1 %v3489_v0 }
  0x5b   : > { %3086 = vmatprep.subr.bf16.mxu0 %v3489_v0 }
  0x5f   : > { %3035 = vmatmul.mubr.msk.bf16.vlgmr.msra.gmra.mxu1 %vm295_vm1, %v3278_v16 }
  0x60   : > { %3077 = vmatmul.mubr.msk.bf16.vlgmr.msra.gmra.mxu0 %vm295_vm1, %v3279_v17  ;;  %3045 = vmatpush3.bf16.msra.mxu1 %v3693_v18  ;;  %v1907_v17 = vld [vmem:[%s3925_s3 + $0x60] sm:$0xff] }
  0x61   : > { %3087 = vmatpush3.bf16.msra.mxu0 %v3647_v6  ;;  %3046 = vmatprep.mubr.msk.bf16.mxu1 %vm3490_vm0, %v3489_v0 }
  0x62   : > { %3088 = vmatprep.mubr.msk.bf16.mxu0 %vm3490_vm0, %v3489_v0  ;;  %3056 = vmatprep.subr.bf16.mxu1 %v3489_v0 }
  0x63   : > { %3098 = vmatprep.subr.bf16.mxu0 %v3489_v0 }
  0x67   : > { %3047 = vmatmul.mubr.msk.bf16.vlgmr.msra.gmra.mxu1 %vm295_vm1, %v3281_v19 }
  0x68   : > { %3089 = vmatmul.mubr.msk.bf16.vlgmr.msra.gmra.mxu0 %vm295_vm1, %v3282_v20  ;;  %3057 = vmatpush3.bf16.msra.mxu1 %v3642_v5 }
  0x69   : > { %3058 = vmatprep.mubr.msk.bf16.mxu1 %vm3490_vm0, %v3489_v0  ;;  %3068 = vmatprep.subr.bf16.mxu1 %v3489_v0 }
  0x6a   : > { %3099 = vmatpush3.bf16.msra.mxu0 %v3633_v1  ;;  %3100 = vmatprep.mubr.msk.bf16.mxu0 %vm3490_vm0, %v3489_v0  ;;  %v1903_v1 = vld [vmem:[%s3925_s3 + $0x40] sm:$0xff] }
  0x6b   : > { %3110 = vmatprep.subr.bf16.mxu0 %v3489_v0  ;;  %1953 = vperm.xlu0 %3261, %v1903_v1  }
  0x6f   : > { %3059 = vmatmul.mubr.msk.bf16.vlgmr.msra.gmra.mxu1 %vm295_vm1, %v3283_v21 }
  0x70   : > { %3069 = vmatpush3.bf16.msra.mxu1 %v3669_v12  ;;  %3070 = vmatprep.mubr.msk.bf16.mxu1 %vm3490_vm0, %v3489_v0 }
  0x71   : > { %3080 = vmatprep.subr.bf16.mxu1 %v3489_v0  ;;  %3101 = vmatmul.mubr.msk.bf16.vlgmr.msra.gmra.mxu0 %vm295_vm1, %v3287_v22 }
  0x72   : > { %3111 = vmatpush3.bf16.msra.mxu0 %v3271_v9  ;;  %3112 = vmatprep.mubr.msk.bf16.mxu0 %vm3490_vm0, %v3489_v0  ;;  %v1905_v9 = vld [vmem:[%s3925_s3 + $0x50] sm:$0xff] }
  0x73   : > { %3122 = vmatprep.subr.bf16.mxu0 %v3489_v0  ;;  %1963 = vperm.xlu0 %3261, %v1905_v9  }
  0x77   : > { %3071 = vmatmul.mubr.msk.bf16.vlgmr.msra.gmra.mxu1 %vm295_vm1, %v3284_v23  ;;  %v1906_v23 = vld [vmem:[%s3925_s3 + $0x58] sm:$0xff]  ;;  %1973 = vperm.xlu0 %3261, %v1907_v17  }
  0x78   : > { %3081 = vmatpush3.bf16.msra.mxu1 %v3681_v15  ;;  %3082 = vmatprep.mubr.msk.bf16.mxu1 %vm3490_vm0, %v3489_v0 }
  0x79   : > { %3092 = vmatprep.subr.bf16.mxu1 %v3489_v0  ;;  %3113 = vmatmul.mubr.msk.bf16.vlgmr.msra.gmra.mxu0 %vm295_vm1, %v3289_v24 }
  0x7a   : > { %3123 = vmatpush3.bf16.msra.mxu0 %v3636_v2  ;;  %3124 = vmatprep.mubr.msk.bf16.mxu0 %vm3490_vm0, %v3489_v0 }
  0x7b   : > { %3134 = vmatprep.subr.bf16.mxu0 %v3489_v0 }
  0x7f   : > { %3083 = vmatmul.mubr.msk.bf16.vlgmr.msra.gmra.mxu1 %vm295_vm1, %v3285_v25  ;;  %v1909_v25 = vld [vmem:[%s3925_s3 + $0x70] sm:$0xff] }
  0x80   : > { %3093 = vmatpush3.bf16.msra.mxu1 %v3693_v18  ;;  %3094 = vmatprep.mubr.msk.bf16.mxu1 %vm3490_vm0, %v3489_v0 }
  0x81   : > { %3104 = vmatprep.subr.bf16.mxu1 %v3489_v0  ;;  %3125 = vmatmul.mubr.msk.bf16.vlgmr.msra.gmra.mxu0 %vm295_vm1, %v3291_v26 }
  0x82   : > { %3135 = vmatpush3.bf16.msra.mxu0 %v3647_v6  ;;  %3136 = vmatprep.mubr.msk.bf16.mxu0 %vm3490_vm0, %v3489_v0 }
  0x83   : > { %2922 = vmatprep.subr.bf16.mxu0 %v3295_v27  ;;  %1983 = vperm.xlu0 %3261, %v1909_v25  }
  0x87   : > { %3095 = vmatmul.mubr.msk.bf16.vlgmr.msra.gmra.mxu1 %vm295_vm1, %v3286_v28 }
  0x88   : > { %3105 = vmatpush3.bf16.msra.mxu1 %v3642_v5  ;;  %3106 = vmatprep.mubr.msk.bf16.mxu1 %vm3490_vm0, %v3489_v0 }
  0x89   : > { %3116 = vmatprep.subr.bf16.mxu1 %v3489_v0  ;;  %3137 = vmatmul.mubr.msk.bf16.vlgmr.msra.gmra.mxu0 %vm295_vm1, %v3293_v29 }
  0x8a   : > { %2923 = vmatpush3.bf16.msra.mxu0 %v3296_v30 }
  0x8b   : > { %2924 = vmatprep.subr.bf16.mxu0 %v3297_v31  ;;  %v1908_v31 = vld [vmem:[%s3925_s3 + $0x68] sm:$0xff] }
  0x8e   : > { %2925 = vmatpush3.bf16.msra.mxu0 %v3298_v32 }
  0x8f   : > { %3107 = vmatmul.mubr.msk.bf16.vlgmr.msra.gmra.mxu1 %vm295_vm1, %v3288_v33  ;;  %2926 = vmatprep.subr.bf16.mxu0 %v3299_v34 }
  0x90   : > { %3117 = vmatpush3.bf16.msra.mxu1 %v3669_v12  ;;  %3118 = vmatprep.mubr.msk.bf16.mxu1 %vm3490_vm0, %v3489_v0 }
  0x91   : > { %3128 = vmatprep.subr.bf16.mxu1 %v3489_v0 }
  0x92   : > { %2927 = vmatpush3.bf16.msra.mxu0 %v3300_v35 }
  0x93   : > { %2928 = vmatprep.subr.bf16.mxu0 %v3301_v36 }
  0x96   : > { %2929 = vmatpush3.bf16.msra.mxu0 %v3302_v37 }
  0x97   : > { %3119 = vmatmul.mubr.msk.bf16.vlgmr.msra.gmra.mxu1 %vm295_vm1, %v3290_v38  ;;  %2930 = vmatprep.subr.bf16.mxu0 %v3303_v39  ;;  %v1910_v38 = vld [vmem:[%s3925_s3 + $0x78] sm:$0xff] }
  0x98   : > { %3129 = vmatpush3.bf16.msra.mxu1 %v3681_v15  ;;  %3130 = vmatprep.mubr.msk.bf16.mxu1 %vm3490_vm0, %v3489_v0  ;;  %v1904_v15 = vld [vmem:[%s3925_s3 + $0x48] sm:$0xff] }
  0x99   : > { %3140 = vmatprep.subr.bf16.mxu1 %v3489_v0 }
  0x9a   : > { %2931 = vmatpush3.bf16.msra.mxu0 %v3304_v40 }
  0x9b   : > { %2932 = vmatprep.subr.bf16.mxu0 %v3305_v41 }
  0x9e   : > { %2933 = vmatpush3.bf16.msra.mxu0 %v3306_v42 }
  0x9f   : > { %3131 = vmatmul.mubr.msk.bf16.vlgmr.msra.gmra.mxu1 %vm295_vm1, %v3292_v43  ;;  %2934 = vmatprep.subr.bf16.mxu0 %v3307_v44 }
  0xa0   : > { %3141 = vmatpush3.bf16.msra.mxu1 %v3693_v18  ;;  %3142 = vmatprep.mubr.msk.bf16.mxu1 %vm3490_vm0, %v3489_v0  ;;  %v1900_v0 = vld [vmem:[%s3925_s3 + $0x28] sm:$0xff] }
  0xa1   : > { %3146 = vmatprep.subr.bf16.mxu1 %v3316_v49  ;;  %1938 = vperm.xlu1 %3262, %v1900_v0  }
  0xa2   : > { %2935 = vmatpush3.bf16.msra.mxu0 %v3308_v45 }
  0xa3   : > { %2936 = vmatprep.subr.bf16.mxu0 %v3309_v46 }
  0xa5   : > { %1948 = vperm.xlu1 %3262, %v1902_v7  }
  0xa6   : > { %2937 = vmatpush3.bf16.msra.mxu0 %v3310_v47 }
  0xa7   : > { %3143 = vmatmul.mubr.msk.bf16.vlgmr.msra.gmra.mxu1 %vm295_vm1, %v3294_v48 }
  0xa8   : > { %3147 = vmatpush3.bf16.msra.mxu1 %v3316_v49 }
  0xa9   : > { %3148 = vmatprep.subr.bf16.mxu1 %v3320_v50  ;;  %1958 = vperm.xlu1 %3262, %v1904_v15  }
  0xac   : > { %3149 = vmatpush3.bf16.msra.mxu1 %v3320_v50 }
  0xad   : > { %3150 = vmatprep.subr.bf16.mxu1 %v3321_v51  ;;  %1968 = vperm.xlu1 %3262, %v1906_v23  }
  0xb0   : > { %3151 = vmatpush3.bf16.msra.mxu1 %v3321_v51 }
  0xb1   : > { %3152 = vmatprep.subr.bf16.mxu1 %v3325_v52  ;;  %1978 = vperm.xlu1 %3262, %v1908_v31  }
  0xb4   : > { %3153 = vmatpush3.bf16.msra.mxu1 %v3325_v52 }
  0xb5   : > { %3154 = vmatprep.subr.bf16.mxu1 %v3326_v53  ;;  %1988 = vperm.xlu1 %3262, %v1910_v38  }
  0xb8   : > { %3155 = vmatpush3.bf16.msra.mxu1 %v3326_v53 }
  0xb9   : > { %3156 = vmatprep.subr.bf16.mxu1 %v3330_v54 }
  0xbc   : > { %3157 = vmatpush3.bf16.msra.mxu1 %v3330_v54 }
  0xbd   : > { %3158 = vmatprep.subr.bf16.mxu1 %v3331_v55 }
  0xc0   : > { %3159 = vmatpush3.bf16.msra.mxu1 %v3331_v55 }
  0xc1   : > { %3160 = vmatprep.subr.bf16.mxu1 %v3334_v56 }
  0xc4   : > { %3161 = vmatpush3.bf16.msra.mxu1 %v3334_v56 }
  0xff   : > { %v333_v2 = vpop.f32.mrf.mxu1 }
 0x100   : > { %v2786_v3 = vpack.c.bf16 %v333_v2, %v333_v2  ;;  %v553_v4 = vpop.f32.mrf.mxu0 }
 0x101   : > { %v2794_v5 = vpack.c.bf16 %v553_v4, %v553_v4  ;;  %v3006_v6 = vpop.f32.mrf.mxu1 }
 0x102   : > { %789 = vst [vmem:[#allocation2] sm:$0xf] %v2786_v3  ;;  %v3030_v8 = vpop.f32.mrf.mxu0 }
 0x103   : > { %797 = vst [vmem:[#allocation2 + $0x60] sm:$0xf] %v2794_v5  ;;  %v336_v10 = vpop.f32.mrf.mxu1 }
 0x104   : > { %v2787_v11 = vpack.c.bf16 %v336_v10, %v336_v10  ;;  %v556_v12 = vpop.f32.mrf.mxu0 }
 0x105   : > { %v2795_v13 = vpack.c.bf16 %v556_v12, %v556_v12  ;;  %v3007_v14 = vpop.f32.mrf.mxu1 }
 0x106   : > { %790 = vst [vmem:[#allocation2 + $0xc] sm:$0xf] %v2787_v11  ;;  %v3031_v16 = vpop.f32.mrf.mxu0 }
 0x107   : > { %798 = vst [vmem:[#allocation2 + $0x6c] sm:$0xf] %v2795_v13  ;;  %v388_v18 = vpop.f32.mrf.mxu1 }
 0x108   : > { %v2788_v19 = vpack.c.bf16 %v388_v18, %v388_v18  ;;  %v663_v20 = vpop.f32.mrf.mxu0 }
 0x109   : > { %v2798_v21 = vpack.c.bf16 %v663_v20, %v663_v20  ;;  %v3012_v22 = vpop.f32.mrf.mxu1 }
 0x10a   : > { %791 = vst [vmem:[#allocation2 + $0x18] sm:$0xf] %v2788_v19  ;;  %v3042_v24 = vpop.f32.mrf.mxu0 }
 0x10b   : > { %801 = vst [vmem:[#allocation2 + $0x90] sm:$0xf] %v2798_v21  ;;  %v391_v26 = vpop.f32.mrf.mxu1 }
 0x10c   : > { %v2789_v27 = vpack.c.bf16 %v391_v26, %v391_v26  ;;  %v666_v28 = vpop.f32.mrf.mxu0 }
 0x10d   : > { %v2799_v29 = vpack.c.bf16 %v666_v28, %v666_v28  ;;  %v3013_v30 = vpop.f32.mrf.mxu1  ;;  %v3311_v58 = vld [vmem:[#allocation2] ss:$12 sps:$4 sm:$0xff]  }
 0x10e   : > { %792 = vst [vmem:[#allocation2 + $0x24] sm:$0xf] %v2789_v27  ;;  %v3043_v32 = vpop.f32.mrf.mxu0 }
 0x10f   : > { %802 = vst [vmem:[#allocation2 + $0x9c] sm:$0xf] %v2799_v29  ;;  %v443_v33 = vpop.f32.mrf.mxu1 }
 0x110   : > { %v2790_v34 = vpack.c.bf16 %v443_v33, %v443_v33  ;;  %v864_v35 = vpop.f32.mrf.mxu0 }
 0x111   : > { %v2802_v36 = vpack.c.bf16 %v864_v35, %v864_v35  ;;  %v3018_v37 = vpop.f32.mrf.mxu1 }
 0x112   : > { %793 = vst [vmem:[#allocation2 + $0x30] sm:$0xf] %v2790_v34  ;;  %v3054_v39 = vpop.f32.mrf.mxu0 }
 0x113   : > { %1278 = vst [vmem:[#allocation2 + $0x4] sm:$0xf] %v2802_v36  ;;  %v446_v40 = vpop.f32.mrf.mxu1 }
 0x114   : > { %v2791_v41 = vpack.c.bf16 %v446_v40, %v446_v40  ;;  %v867_v42 = vpop.f32.mrf.mxu0 }
 0x115   : > { %v2803_v43 = vpack.c.bf16 %v867_v42, %v867_v42  ;;  %v3019_v44 = vpop.f32.mrf.mxu1  ;;  %v3317_v42 = vld [vmem:[#allocation2 + $0x18] ss:$12 sps:$4 sm:$0xff]  }
 0x116   : > { %794 = vst [vmem:[#allocation2 + $0x3c] sm:$0xf] %v2791_v41  ;;  %v3055_v45 = vpop.f32.mrf.mxu0 }
 0x117   : > { %1279 = vst [vmem:[#allocation2 + $0x10] sm:$0xf] %v2803_v43  ;;  %v498_v46 = vpop.f32.mrf.mxu1 }
 0x118   : > { %v2792_v47 = vpack.c.bf16 %v498_v46, %v498_v46  ;;  %v962_v48 = vpop.f32.mrf.mxu0 }
 0x119   : > { %v2806_v49 = vpack.c.bf16 %v962_v48, %v962_v48  ;;  %v3024_v50 = vpop.f32.mrf.mxu1 }
 0x11a   : > { %795 = vst [vmem:[#allocation2 + $0x48] sm:$0xf] %v2792_v47  ;;  %v3066_v51 = vpop.f32.mrf.mxu0 }
 0x11b   : > { %1282 = vst [vmem:[#allocation2 + $0x34] sm:$0xf] %v2806_v49  ;;  %v501_v52 = vpop.f32.mrf.mxu1 }
 0x11c   : > { %v2793_v53 = vpack.c.bf16 %v501_v52, %v501_v52  ;;  %v965_v54 = vpop.f32.mrf.mxu0 }
 0x11d   : > { %v2807_v55 = vpack.c.bf16 %v965_v54, %v965_v54  ;;  %v3025_v56 = vpop.f32.mrf.mxu1 }
 0x11e   : > { %796 = vst [vmem:[#allocation2 + $0x54] sm:$0xf] %v2793_v53  ;;  %v3067_v57 = vpop.f32.mrf.mxu0  ;;  %v3313_v59 = vld [vmem:[#allocation2 + $0x4] ss:$12 sps:$4 sm:$0xff]  }
 0x11f   : > { %1283 = vst [vmem:[#allocation2 + $0x40] sm:$0xf] %v2807_v55  ;;  %v608_v60 = vpop.f32.mrf.mxu1  ;;  %2295 = vmatprep.mubr.bf16.mxu0 %v3313_v59 }
 0x120   : > { %v2796_v61 = vpack.c.bf16 %v608_v60, %v608_v60  ;;  %v1060_v62 = vpop.f32.mrf.mxu0  ;;  %2296 = vmatmul.mubr.bf16.vlgmr.msra.gmra.mxu0 %v3311_v58  ;;  %v3322_v58 = vld [vmem:[#allocation2 + $0x30] ss:$12 sps:$4 sm:$0xff]  }
 0x121   : > { %v2810_v63 = vpack.c.bf16 %v1060_v62, %v1060_v62  ;;  %v3036_v0 = vpop.f32.mrf.mxu1 }
 0x122   : > { %799 = vst [vmem:[#allocation2 + $0x78] sm:$0xf] %v2796_v61  ;;  %v3078_v1 = vpop.f32.mrf.mxu0 }
 0x123   : > { %1286 = vst [vmem:[#allocation2 + $0x64] sm:$0xf] %v2810_v63  ;;  %v611_v2 = vpop.f32.mrf.mxu1 }
 0x124   : > { %v2797_v3 = vpack.c.bf16 %v611_v2, %v611_v2  ;;  %v1063_v4 = vpop.f32.mrf.mxu0 }
 0x125   : > { %v2811_v5 = vpack.c.bf16 %v1063_v4, %v1063_v4  ;;  %v3037_v6 = vpop.f32.mrf.mxu1 }
 0x126   : > { %800 = vst [vmem:[#allocation2 + $0x84] sm:$0xf] %v2797_v3  ;;  %v3079_v7 = vpop.f32.mrf.mxu0  ;;  %v3318_v46 = vld [vmem:[#allocation2 + $0x34] ss:$12 sps:$4 sm:$0xff]  }
 0x127   : > { %1287 = vst [vmem:[#allocation2 + $0x70] sm:$0xf] %v2811_v5  ;;  %v718_v8 = vpop.f32.mrf.mxu1 }
 0x128   : > { %v2800_v9 = vpack.c.bf16 %v718_v8, %v718_v8  ;;  %v1158_v10 = vpop.f32.mrf.mxu0  ;;  %v3327_v8 = vld [vmem:[#allocation2 + $0x48] ss:$12 sps:$4 sm:$0xff]  }
 0x129   : > { %v2814_v11 = vpack.c.bf16 %v1158_v10, %v1158_v10  ;;  %v3048_v12 = vpop.f32.mrf.mxu1 }
 0x12a   : > { %803 = vst [vmem:[#allocation2 + $0xa8] sm:$0xf] %v2800_v9  ;;  %v3090_v13 = vpop.f32.mrf.mxu0 }
 0x12b   : > { %1290 = vst [vmem:[#allocation2 + $0x94] sm:$0xf] %v2814_v11  ;;  %v721_v14 = vpop.f32.mrf.mxu1 }
 0x12c   : > { %v2801_v15 = vpack.c.bf16 %v721_v14, %v721_v14  ;;  %v1161_v16 = vpop.f32.mrf.mxu0 }
 0x12d   : > { %v2815_v17 = vpack.c.bf16 %v1161_v16, %v1161_v16  ;;  %v3049_v18 = vpop.f32.mrf.mxu1 }
 0x12e   : > { %804 = vst [vmem:[#allocation2 + $0xb4] sm:$0xf] %v2801_v15  ;;  %v3091_v19 = vpop.f32.mrf.mxu0  ;;  %v3328_v11 = vld [vmem:[#allocation2 + $0x64] ss:$12 sps:$4 sm:$0xff]  }
 0x12f   : > { %1291 = vst [vmem:[#allocation2 + $0xa0] sm:$0xf] %v2815_v17  ;;  %v913_v20 = vpop.f32.mrf.mxu1  ;;  %v1801_v15 = vld [vmem:[#allocation2 + $0x6c] sm:$0xff]  ;;  %v1799_v18 = vld [vmem:[#allocation2 + $0x60] sm:$0xff] }
 0x130   : > { %v2804_v21 = vpack.c.bf16 %v913_v20, %v913_v20  ;;  %v2744_v20 = vcombine.low %v1799_v18, %v1801_v15 }
 0x131   : > { %v3060_v22 = vpop.f32.mrf.mxu1  ;;  %v1353_v23 = vpop.f32.mrf.mxu0 }
 0x132   : > { %1280 = vst [vmem:[#allocation2 + $0x1c] sm:$0xf] %v2804_v21  ;;  %v2818_v24 = vpack.c.bf16 %v1353_v23, %v1353_v23 }
 0x133   : > { %v916_v25 = vpop.f32.mrf.mxu1  ;;  %v3102_v26 = vpop.f32.mrf.mxu0 }
 0x134   : > { %v2805_v27 = vpack.c.bf16 %v916_v25, %v916_v25  ;;  %1767 = vst [vmem:[#allocation2 + $0x8] sm:$0xf] %v2818_v24 }
 0x135   : > { %v3061_v28 = vpop.f32.mrf.mxu1  ;;  %v1356_v29 = vpop.f32.mrf.mxu0 }
 0x136   : > { %1281 = vst [vmem:[#allocation2 + $0x28] sm:$0xf] %v2805_v27  ;;  %v2819_v30 = vpack.c.bf16 %v1356_v29, %v1356_v29 }
 0x137   : > { %v1011_v31 = vpop.f32.mrf.mxu1  ;;  %v3103_v32 = vpop.f32.mrf.mxu0 }
 0x138   : > { %v2808_v33 = vpack.c.bf16 %v1011_v31, %v1011_v31  ;;  %1768 = vst [vmem:[#allocation2 + $0x14] sm:$0xf] %v2819_v30 }
 0x139   : > { %v3072_v34 = vpop.f32.mrf.mxu1  ;;  %v1451_v35 = vpop.f32.mrf.mxu0 }
 0x13a   : > { %1284 = vst [vmem:[#allocation2 + $0x4c] sm:$0xf] %v2808_v33  ;;  %v2822_v36 = vpack.c.bf16 %v1451_v35, %v1451_v35  ;;  %v3337_v34 = vld [vmem:[#allocation2 + $0x94] ss:$12 sps:$4 sm:$0xff]  }
 0x13b   : > { %v1014_v37 = vpop.f32.mrf.mxu1  ;;  %v3114_v38 = vpop.f32.mrf.mxu0 }
 0x13c   : > { %v2809_v39 = vpack.c.bf16 %v1014_v37, %v1014_v37  ;;  %1771 = vst [vmem:[#allocation2 + $0x38] sm:$0xf] %v2822_v36  ;;  %v1809_v37 = vld [vmem:[#allocation2 + $0x9c] sm:$0xff] }
 0x13d   : > { %v3073_v40 = vpop.f32.mrf.mxu1  ;;  %v3314_v41 = vld [vmem:[#allocation2 + $0x1c] ss:$12 sps:$4 sm:$0xff]   ;;  %v1454_v43 = vpop.f32.mrf.mxu0 }
 0x13e   : > { %1285 = vst [vmem:[#allocation2 + $0x58] sm:$0xf] %v2809_v39  ;;  %v2823_v44 = vpack.c.bf16 %v1454_v43, %v1454_v43  ;;  %2303 = vmatprep.mubr.bf16.mxu0 %v3314_v41  ;;  %v1807_v41 = vld [vmem:[#allocation2 + $0x90] sm:$0xff] }
 0x13f   : > { %v1109_v45 = vpop.f32.mrf.mxu1  ;;  %v3115_v47 = vpop.f32.mrf.mxu0  ;;  %v3335_v48 = vld [vmem:[#allocation2 + $0x8] ss:$12 sps:$4 sm:$0xff]   ;;  %2304 = vmatmul.mubr.bf16.gmra.mxu0 %v3317_v42 }
 0x140   : > { %v2812_v49 = vpack.c.bf16 %v1109_v45, %v1109_v45  ;;  %1772 = vst [vmem:[#allocation2 + $0x44] sm:$0xf] %v2823_v44  ;;  %2311 = vmatprep.mubr.bf16.mxu0 %v3318_v46  ;;  %3162 = vmatprep.mubr.bf16.mxu1 %v3335_v48  ;;  %v2750_v44 = vcombine.low %v1807_v41, %v1809_v37 }
 0x141   : > { %v3084_v50 = vpop.f32.mrf.mxu1  ;;  %v1549_v51 = vpop.f32.mrf.mxu0 }
 0x142   : > { %1288 = vst [vmem:[#allocation2 + $0x7c] sm:$0xf] %v2812_v49  ;;  %v2826_v52 = vpack.c.bf16 %v1549_v51, %v1549_v51 }
 0x143   : > { %v1112_v53 = vpop.f32.mrf.mxu1  ;;  %v3126_v54 = vpop.f32.mrf.mxu0 }
 0x144   : > { %v2813_v55 = vpack.c.bf16 %v1112_v53, %v1112_v53  ;;  %1775 = vst [vmem:[#allocation2 + $0x68] sm:$0xf] %v2826_v52 }
 0x145   : > { %v3085_v56 = vpop.f32.mrf.mxu1  ;;  %v1552_v57 = vpop.f32.mrf.mxu0  ;;  %v3323_v61 = vld [vmem:[#allocation2 + $0x4c] ss:$12 sps:$4 sm:$0xff]  }
 0x146   : > { %1289 = vst [vmem:[#allocation2 + $0x88] sm:$0xf] %v2813_v55  ;;  %v2827_v59 = vpack.c.bf16 %v1552_v57, %v1552_v57 }
 0x147   : > { %v1207_v60 = vpop.f32.mrf.mxu1  ;;  %v3127_v62 = vpop.f32.mrf.mxu0  ;;  %2312 = vmatmul.mubr.bf16.gmra.mxu0 %v3322_v58  ;;  %v3339_v28 = vld [vmem:[#allocation2 + $0x38] ss:$12 sps:$4 sm:$0xff]  }
 0x148   : > { %v2816_v63 = vpack.c.bf16 %v1207_v60, %v1207_v60  ;;  %1776 = vst [vmem:[#allocation2 + $0x74] sm:$0xf] %v2827_v59  ;;  %2319 = vmatprep.mubr.bf16.mxu0 %v3323_v61 }
 0x149   : > { %v3096_v0 = vpop.f32.mrf.mxu1  ;;  %v1647_v1 = vpop.f32.mrf.mxu0  ;;  %v1803_v29 = vld [vmem:[#allocation2 + $0x78] sm:$0xff] }
 0x14a   : > { %1292 = vst [vmem:[#allocation2 + $0xac] sm:$0xf] %v2816_v63  ;;  %v2830_v2 = vpack.c.bf16 %v1647_v1, %v1647_v1 }
 0x14b   : > { %v1210_v3 = vpop.f32.mrf.mxu1  ;;  %v3138_v4 = vpop.f32.mrf.mxu0 }
 0x14c   : > { %v2817_v5 = vpack.c.bf16 %v1210_v3, %v1210_v3  ;;  %1779 = vst [vmem:[#allocation2 + $0x98] sm:$0xf] %v2830_v2  ;;  %v1914_v4 = vpop.permute.xlu0 %1913 }
 0x14d   : > { %v3097_v6 = vpop.f32.mrf.mxu1  ;;  %v1650_v7 = vpop.f32.mrf.mxu0  ;;  %v3332_v22 = vld [vmem:[#allocation2 + $0x7c] ss:$12 sps:$4 sm:$0xff]  }
 0x14e   : > { %1293 = vst [vmem:[#allocation2 + $0xb8] sm:$0xf] %v2817_v5  ;;  %v2831_v9 = vpack.c.bf16 %v1650_v7, %v1650_v7  ;;  %v1805_v25 = vld [vmem:[#allocation2 + $0x84] sm:$0xff]  ;;  %v1924_v6 = vpop.permute.xlu1 %1923 }
 0x14f   : > { %v1402_v10 = vpop.f32.mrf.mxu1  ;;  %v3139_v12 = vpop.f32.mrf.mxu0  ;;  %2320 = vmatmul.mubr.bf16.gmra.mxu0 %v3327_v8  ;;  %v2747_v32 = vcombine.low %v1803_v29, %v1805_v25  ;;  %v3343_v40 = vld [vmem:[#allocation2 + $0x68] ss:$12 sps:$4 sm:$0xff]  }
 0x150   : > { %v2820_v13 = vpack.c.bf16 %v1402_v10, %v1402_v10  ;;  %1780 = vst [vmem:[#allocation2 + $0xa4] sm:$0xf] %v2831_v9  ;;  %2327 = vmatprep.mubr.bf16.mxu0 %v3328_v11  ;;  %v1919_v9 = vpop.permute.xlu0 %1918 }
 0x151   : > { %v3108_v14 = vpop.f32.mrf.mxu1  ;;  %v1811_v53 = vld [vmem:[#allocation2 + $0xa8] sm:$0xff] }
 0x152   : > { %1769 = vst [vmem:[#allocation2 + $0x20] sm:$0xf] %v2820_v13  ;;  %v1929_v11 = vpop.permute.xlu1 %1928 }
 0x153   : > { %v1405_v16 = vpop.f32.mrf.mxu1 }
 0x154   : > { %v2821_v17 = vpack.c.bf16 %v1405_v16, %v1405_v16  ;;  %v1934_v13 = vpop.permute.xlu0 %1933 }
 0x155   : > { %v3109_v19 = vpop.f32.mrf.mxu1  ;;  %v3341_v46 = vld [vmem:[#allocation2 + $0xac] ss:$12 sps:$4 sm:$0xff]  }
 0x156   : > { %1770 = vst [vmem:[#allocation2 + $0x2c] sm:$0xf] %v2821_v17  ;;  %v1813_v49 = vld [vmem:[#allocation2 + $0xb4] sm:$0xff]  ;;  %v3817_v17 = vpop.permute.xlu1 %1938  ;;  %v2867_v19 = vld [vmem:[%s3630_s6 + $0x8] sm:$0xff]  }
 0x157   : > { %v1500_v21 = vpop.f32.mrf.mxu1  ;;  %2328 = vmatmul.mubr.bf16.gmra.mxu0 %v2744_v20  ;;  %v3345_v52 = vld [vmem:[#allocation2 + $0x98] ss:$12 sps:$4 sm:$0xff]   ;;  %v2753_v56 = vcombine.low %v1811_v53, %v1813_v49 }
 0x158   : > { %v2824_v23 = vpack.c.bf16 %v1500_v21, %v1500_v21  ;;  %2335 = vmatprep.mubr.bf16.mxu0 %v3332_v22  ;;  %v1944_v21 = vpop.permute.xlu0 %1943 }
 0x159   : > { %v3120_v24 = vpop.f32.mrf.mxu1 }
 0x15a   : > { %1773 = vst [vmem:[#allocation2 + $0x50] sm:$0xf] %v2824_v23  ;;  %v2836_v23 = vld [vmem:[%s3630_s6] sm:$0xff]  }
 0x15b   : > { %v1503_v26 = vpop.f32.mrf.mxu1 }
 0x15c   : > { %v2825_v27 = vpack.c.bf16 %v1503_v26, %v1503_v26 }
 0x15d   : > { %v3121_v30 = vpop.f32.mrf.mxu1  ;;  %v3336_v31 = vld [vmem:[#allocation2 + $0x20] ss:$12 sps:$4 sm:$0xff]  }
 0x15e   : > { %1774 = vst [vmem:[#allocation2 + $0x5c] sm:$0xf] %v2825_v27  ;;  %3163 = vmatmul.mubr.bf16.vlgmr.msra.gmra.mxu1 %v3336_v31  ;;  %v2841_v27 = vunpack.c.l.bf16 %v2867_v19  ;;  %v1949_v31 = vpop.permute.xlu1 %1948 }
 0x15f   : > { %v1598_v33 = vpop.f32.mrf.mxu1  ;;  %2336 = vmatmul.mubr.bf16.gmra.mxu0 %v2747_v32  ;;  %3166 = vmatprep.mubr.bf16.mxu1 %v3339_v28 }
 0x160   : > { %v2828_v35 = vpack.c.bf16 %v1598_v33, %v1598_v33  ;;  %2343 = vmatprep.mubr.bf16.mxu0 %v3337_v34  ;;  %v2837_v34 = vunpack.c.l.bf16 %v2836_v23 }
 0x161   : > { %v3132_v36 = vpop.f32.mrf.mxu1 }
 0x162   : > { %1777 = vst [vmem:[#allocation2 + $0x80] sm:$0xf] %v2828_v35 }
 0x163   : > { %v1601_v38 = vpop.f32.mrf.mxu1 }
 0x164   : > { %v2829_v39 = vpack.c.bf16 %v1601_v38, %v1601_v38  ;;  %v3830_v38 = vpop.permute.xlu0 %1953 }
 0x165   : > { %v3133_v42 = vpop.f32.mrf.mxu1  ;;  %v3340_v43 = vld [vmem:[#allocation2 + $0x50] ss:$12 sps:$4 sm:$0xff]  }
 0x166   : > { %1778 = vst [vmem:[#allocation2 + $0x8c] sm:$0xf] %v2829_v39  ;;  %3167 = vmatmul.mubr.bf16.gmra.mxu1 %v3340_v43  ;;  %v2842_v42 = vunpack.c.h.bf16 %v2867_v19  ;;  %v2869_v43 = vld [vmem:[%s3630_s6 + $0x18] sm:$0xff]  }
 0x167   : > { %v1696_v45 = vpop.f32.mrf.mxu1  ;;  %2344 = vmatmul.mubr.bf16.gmra.mxu0 %v2750_v44  ;;  %3170 = vmatprep.mubr.bf16.mxu1 %v3343_v40 }
 0x168   : > { %v2832_v47 = vpack.c.bf16 %v1696_v45, %v1696_v45  ;;  %2351 = vmatprep.mubr.bf16.mxu0 %v3341_v46  ;;  %v2838_v46 = vunpack.c.h.bf16 %v2836_v23 }
 0x169   : > { %v3144_v48 = vpop.f32.mrf.mxu1 }
 0x16a   : > { %1781 = vst [vmem:[#allocation2 + $0xb0] sm:$0xf] %v2832_v47 }
 0x16b   : > { %v1699_v50 = vpop.f32.mrf.mxu1 }
 0x16c   : > { %v2833_v51 = vpack.c.bf16 %v1699_v50, %v1699_v50 }
 0x16d   : > { %v3145_v54 = vpop.f32.mrf.mxu1  ;;  %v3344_v55 = vld [vmem:[#allocation2 + $0x80] ss:$12 sps:$4 sm:$0xff]  }
 0x16e   : > { %1782 = vst [vmem:[#allocation2 + $0xbc] sm:$0xf] %v2833_v51  ;;  %3171 = vmatmul.mubr.bf16.gmra.mxu1 %v3344_v55  ;;  %v2849_v54 = vunpack.c.l.bf16 %v2869_v43 }
 0x16f   : > { %2352 = vmatmul.mubr.bf16.gmra.mxu0 %v2753_v56  ;;  %3174 = vmatprep.mubr.bf16.mxu1 %v3345_v52  ;;  %v2868_v52 = vld [vmem:[%s3630_s6 + $0x10] sm:$0xff]   ;;  %v3834_v56 = vpop.permute.xlu1 %1958 }
 0x173   : > { %v1969_v23 = vpop.permute.xlu1 %1968 }
 0x175   : > { %v3346_v57 = vld [vmem:[#allocation2 + $0xb0] ss:$12 sps:$4 sm:$0xff]  }
 0x176   : > { %3175 = vmatmul.mubr.bf16.gmra.mxu1 %v3346_v57 }
 0x1e0   : > { %v2938_v58 = vpop.f32.mrf.mxu0 }
 0x1e2   : > { %v2939_v59 = vpop.f32.mrf.mxu0 }
 0x1e3   : > { %v2940_v20 = vadd.f32 %v2939_v59, %v2938_v58 }
 0x1e4   : > { %v2941_v60 = vpop.f32.mrf.mxu0 }
 0x1e5   : > { %v2298_v29 = vadd.f32 %v2940_v20, %v1914_v4  ;;  %v2871_v20 = vld [vmem:[%s3630_s6 + $0x28] sm:$0xff]  }
 0x1e6   : > { %v2942_v61 = vpop.f32.mrf.mxu0 }
 0x1e7   : > { %v2943_v30 = vadd.f32 %v2942_v61, %v2941_v60 }
 0x1e9   : > { %v2301_v47 = vadd.f32 %v2943_v30, %v1919_v9  ;;  %v2870_v30 = vld [vmem:[%s3630_s6 + $0x20] sm:$0xff]  }
 0x1ff   : > { %v2944_v62 = vpop.f32.mrf.mxu0 }
 0x201   : > { %v2945_v63 = vpop.f32.mrf.mxu0 }
 0x202   : > { %v2946_v16 = vadd.f32 %v2945_v63, %v2944_v62 }
 0x203   : > { %v2947_v0 = vpop.f32.mrf.mxu0 }
 0x204   : > { %v2306_v24 = vadd.f32 %v2946_v16, %v1924_v6 }
 0x205   : > { %v2948_v1 = vpop.f32.mrf.mxu0 }
 0x206   : > { %v2949_v25 = vadd.f32 %v2948_v1, %v2947_v0  ;;  %v2845_v0 = vunpack.c.l.bf16 %v2868_v52 }
 0x207   : > { %v2950_v2 = vpop.f32.mrf.mxu0 }
 0x208   : > { %v2309_v37 = vadd.f32 %v2949_v25, %v1929_v11  ;;  %v2850_v11 = vunpack.c.h.bf16 %v2869_v43 }
 0x209   : > { %v2951_v3 = vpop.f32.mrf.mxu0 }
 0x20a   : > { %v2952_v44 = vadd.f32 %v2951_v3, %v2950_v2  ;;  %v1964_v2 = vpop.permute.xlu0 %1963 }
 0x20b   : > { %v3813_v5 = vpop.f32.mrf.mxu0 }
 0x20c   : > { %v2314_v62 = vadd.f32 %v2952_v44, %v1934_v13 }
 0x20d   : > { %v2954_v7 = vpop.f32.mrf.mxu0 }
 0x20e   : > { %v2955_v1 = vadd.f32 %v2954_v7, %v3813_v5 }
 0x20f   : > { %v2956_v8 = vpop.f32.mrf.mxu0 }
 0x211   : > { %v2957_v10 = vpop.f32.mrf.mxu0 }
 0x212   : > { %v2958_v35 = vadd.f32 %v2957_v10, %v2956_v8 }
 0x213   : > { %v2959_v12 = vpop.f32.mrf.mxu0 }
 0x214   : > { %v2322_v55 = vadd.f32 %v2958_v35, %v1944_v21  ;;  %v2846_v21 = vunpack.c.h.bf16 %v2868_v52 }
 0x215   : > { %v2960_v14 = vpop.f32.mrf.mxu0 }
 0x216   : > { %v2961_v57 = vadd.f32 %v2960_v14, %v2959_v12 }
 0x217   : > { %v3815_v15 = vpop.f32.mrf.mxu0 }
 0x218   : > { %v2325_v19 = vadd.f32 %v2961_v57, %v1949_v31 }
 0x219   : > { %v3819_v18 = vpop.f32.mrf.mxu0 }
 0x21a   : > { %v2964_v5 = vadd.f32 %v3819_v18, %v3815_v15 }
 0x21b   : > { %v3822_v22 = vpop.f32.mrf.mxu0 }
 0x21d   : > { %v3826_v26 = vpop.f32.mrf.mxu0 }
 0x21e   : > { %v3164_v28 = vpop.f32.mrf.mxu1 }
 0x21f   : > { %v2403_v32 = vadd.f32 %v3164_v28, %v2306_v24  ;;  %v2968_v33 = vpop.f32.mrf.mxu0 }
 0x220   : > { %v2394_v36 = vpop.f32.mrf.mxu1 }
 0x221   : > { %v2459_v39 = vadd.f32 %v2841_v27, %v2403_v32  ;;  %v2395_v40 = vadd.f32 %v2394_v36, %v2298_v29  ;;  %v2969_v41 = vpop.f32.mrf.mxu0  ;;  %v2317_v29 = vadd.f32 %v2955_v1, %v3817_v17  ;;  %v2967_v17 = vadd.f32 %v3826_v26, %v3822_v22 }
 0x222   : > { %v3165_v45 = vpop.f32.mrf.mxu1  ;;  %v2970_v9 = vadd.f32 %v2969_v41, %v2968_v33  ;;  %v2857_v33 = vunpack.c.l.bf16 %v2871_v20  ;;  %v2330_v41 = vadd.f32 %v2964_v5, %v3830_v38 }
 0x223   : > { %v2475_v48 = vmax.f32 %v2459_v39, 0.0  ;;  %v2457_v49 = vadd.f32 %v2837_v34, %v2395_v40  ;;  %v2406_v50 = vadd.f32 %v3165_v45, %v2309_v37  ;;  %v2971_v51 = vpop.f32.mrf.mxu0  ;;  %v1974_v34 = vpop.permute.xlu0 %1973  ;;  %v2853_v40 = vunpack.c.l.bf16 %v2870_v30 }
 0x224   : > { %v2397_v53 = vpop.f32.mrf.mxu1  ;;  %v2338_v31 = vadd.f32 %v2970_v9, %v1964_v2 }
 0x225   : > { %2491 = vst [vmem:[%s3836_s11 + $0x10] sm:$0xff] %v2475_v48  ;;  %v2473_v58 = vmax.f32 %v2457_v49, 0.0  ;;  %v2460_v59 = vadd.f32 %v2842_v42, %v2406_v50  ;;  %v2398_v60 = vadd.f32 %v2397_v53, %v2301_v47  ;;  %v2972_v61 = vpop.f32.mrf.mxu0  ;;  %v2858_v47 = vunpack.c.h.bf16 %v2871_v20  ;;  %v1979_v48 = vpop.permute.xlu1 %1978 }
 0x226   : > { %v3168_v63 = vpop.f32.mrf.mxu1  ;;  %v2973_v35 = vadd.f32 %v2972_v61, %v2971_v51 }
 0x227   : > { %2489 = vst [vmem:[%s3836_s11] sm:$0xff] %v2473_v58  ;;  %v2476_v3 = vmax.f32 %v2460_v59, 0.0  ;;  %v2458_v4 = vadd.f32 %v2838_v46, %v2398_v60  ;;  %v2419_v6 = vadd.f32 %v3168_v63, %v2322_v55  ;;  %v2974_v8 = vpop.f32.mrf.mxu0  ;;  %v2873_v55 = vld [vmem:[%s3630_s6 + $0x38] sm:$0xff]   ;;  %v1984_v57 = vpop.permute.xlu0 %1983  ;;  %v2872_v63 = vld [vmem:[%s3630_s6 + $0x30] sm:$0xff]   ;;  %s2834_s6 = sshll.u32 %s3475_s18, 11  ;;  %s3399_s18 = scalar_lea.vmem %s3871_s12, 2048 }
 0x228   : > { %v2410_v10 = vpop.f32.mrf.mxu1  ;;  %v2341_v38 = vadd.f32 %v2973_v35, %v1969_v23  ;;  %s3869_s21 = scalar_lea.hbm %s3926_s4, %s2834_s6  ;;  %p3400_p8 = scmp.ne.s32.totalorder %s3871_s12, %s3399_s18 }
 0x229   : > { %2492 = vst [vmem:[%s3836_s11 + $0x18] sm:$0xff] %v2476_v3  ;;  %v2474_v12 = vmax.f32 %v2458_v4, 0.0  ;;  %v2463_v14 = vadd.f32 %v2849_v54, %v2419_v6  ;;  %v2411_v13 = vadd.f32 %v2410_v10, %v2314_v62  ;;  %v2975_v16 = vpop.f32.mrf.mxu0  ;;  %v2854_v54 = vunpack.c.h.bf16 %v2870_v30  ;;  %p3407_p6 = scmp.lt.s32.totalorder %s3405_s29, %s3399_s18 }
 0x22a   : > { %v3169_v7 = vpop.f32.mrf.mxu1  ;;  %v2976_v53 = vadd.f32 %v2975_v16, %v2974_v8  ;;  %v2333_v62 = vadd.f32 %v2967_v17, %v3834_v56  ;;  %v2865_v8 = vunpack.c.l.bf16 %v2873_v55  ;;  %p3401_p11 = pnand %p3400_p8, %p3933_p10 }
 0x22b   : > { %2490 = vst [vmem:[%s3836_s11 + $0x8] sm:$0xff] %v2474_v12  ;;  %v2479_v24 = vmax.f32 %v2463_v14, 0.0  ;;  %v2461_v25 = vadd.f32 %v2845_v0, %v2411_v13  ;;  %v2422_v27 = vadd.f32 %v3169_v7, %v2325_v19  ;;  %v2977_v28 = vpop.f32.mrf.mxu0  ;;  %v1989_v14 = vpop.permute.xlu1 %1988  ;;  %p3408_p7 = por %p3407_p6, %p3406_p0 }
 0x22c   : > { %v2413_v32 = vpop.f32.mrf.mxu1  ;;  %v2346_v12 = vadd.f32 %v2976_v53, %v1974_v34  ;;  %p3402_p13 = pneg %p3401_p11 }
 0x22d   : > { %2495 = vst [vmem:[%s3836_s11 + $0x30] sm:$0xff] %v2479_v24  ;;  %v2477_v15 = vmax.f32 %v2461_v25, 0.0  ;;  %v2464_v18 = vadd.f32 %v2850_v11, %v2422_v27  ;;  %v2414_v36 = vadd.f32 %v2413_v32, %v2317_v29  ;;  %v2978_v37 = vpop.f32.mrf.mxu0  ;;  %v2861_v11 = vunpack.c.l.bf16 %v2872_v63 }
 0x22e   : > { %v3172_v39 = vpop.f32.mrf.mxu1  ;;  %v2979_v13 = vadd.f32 %v2978_v37, %v2977_v28  ;;  %v2866_v24 = vunpack.c.h.bf16 %v2873_v55  ;;  %v2862_v27 = vunpack.c.h.bf16 %v2872_v63  ;;  %p3409_p9 = pnand %p3408_p7, %p3402_p13 }
 0x22f   : > { %2493 = vst [vmem:[%s3836_s11 + $0x20] sm:$0xff] %v2477_v15  ;;  %v2480_v42 = vmax.f32 %v2464_v18, 0.0  ;;  %v2462_v43 = vadd.f32 %v2846_v21, %v2414_v36  ;;  %v2435_v44 = vadd.f32 %v3172_v39, %v2338_v31  ;;  %v2980_v45 = vpop.f32.mrf.mxu0 }
 0x230   : > { %v2426_v46 = vpop.f32.mrf.mxu1  ;;  %v2349_v32 = vadd.f32 %v2979_v13, %v1979_v48 }
 0x231   : > { %2496 = vst [vmem:[%s3836_s11 + $0x38] sm:$0xff] %v2480_v42  ;;  %v2478_v49 = vmax.f32 %v2462_v43, 0.0  ;;  %v2467_v50 = vadd.f32 %v2857_v33, %v2435_v44  ;;  %v2427_v51 = vadd.f32 %v2426_v46, %v2330_v41  ;;  %v2981_v52 = vpop.f32.mrf.mxu0 }
 0x232   : > { %v2982_v22 = vadd.f32 %v2981_v52, %v2980_v45  ;;  %v3173_v26 = vpop.f32.mrf.mxu1 }
 0x233   : > { %2494 = vst [vmem:[%s3836_s11 + $0x28] sm:$0xff] %v2478_v49  ;;  %v2483_v58 = vmax.f32 %v2467_v50, 0.0  ;;  %v2465_v59 = vadd.f32 %v2853_v40, %v2427_v51  ;;  %v2438_v60 = vadd.f32 %v3173_v26, %v2341_v38  ;;  %v2983_v61 = vpop.f32.mrf.mxu0 }
 0x234   : > { %v2429_v0 = vpop.f32.mrf.mxu1  ;;  %v2354_v1 = vadd.f32 %v2982_v22, %v1984_v57 }
 0x235   : > { %2499 = vst [vmem:[%s3836_s11 + $0x50] sm:$0xff] %v2483_v58  ;;  %v2481_v2 = vmax.f32 %v2465_v59, 0.0  ;;  %v2468_v3 = vadd.f32 %v2858_v47, %v2438_v60  ;;  %v2430_v4 = vadd.f32 %v2429_v0, %v2333_v62  ;;  %v2984_v6 = vpop.f32.mrf.mxu0 }
 0x236   : > { %v2985_v9 = vadd.f32 %v2984_v6, %v2983_v61  ;;  %v3176_v10 = vpop.f32.mrf.mxu1 }
 0x237   : > { %2497 = vst [vmem:[%s3836_s11 + $0x40] sm:$0xff] %v2481_v2  ;;  %v2484_v56 = vmax.f32 %v2468_v3, 0.0  ;;  %v2466_v16 = vadd.f32 %v2854_v54, %v2430_v4  ;;  %v2451_v19 = vadd.f32 %v3176_v10, %v2354_v1 }
 0x238   : > { %v2442_v20 = vpop.f32.mrf.mxu1  ;;  %v2357_v5 = vadd.f32 %v2985_v9, %v1989_v14 }
 0x239   : > { %2500 = vst [vmem:[%s3836_s11 + $0x58] sm:$0xff] %v2484_v56  ;;  %v2482_v7 = vmax.f32 %v2466_v16, 0.0  ;;  %v2471_v21 = vadd.f32 %v2865_v8, %v2451_v19  ;;  %v2443_v23 = vadd.f32 %v2442_v20, %v2346_v12 }
 0x23a   : > { %v3177_v25 = vpop.f32.mrf.mxu1 }
 0x23b   : > { %2498 = vst [vmem:[%s3836_s11 + $0x48] sm:$0xff] %v2482_v7  ;;  %v2487_v29 = vmax.f32 %v2471_v21, 0.0  ;;  %v2469_v28 = vadd.f32 %v2861_v11, %v2443_v23  ;;  %v2454_v30 = vadd.f32 %v3177_v25, %v2357_v5 }
 0x23c   : > { %v2445_v33 = vpop.f32.mrf.mxu1 }
 0x23d   : > { %2503 = vst [vmem:[%s3836_s11 + $0x70] sm:$0xff] %v2487_v29  ;;  %v2485_v31 = vmax.f32 %v2469_v28, 0.0  ;;  %v2472_v34 = vadd.f32 %v2866_v24, %v2454_v30  ;;  %v2446_v35 = vadd.f32 %v2445_v33, %v2349_v32 }
 0x23f   : > { %2501 = vst [vmem:[%s3836_s11 + $0x60] sm:$0xff] %v2485_v31  ;;  %v2488_v15 = vmax.f32 %v2472_v34, 0.0  ;;  %v2470_v18 = vadd.f32 %v2862_v27, %v2446_v35 }
 0x241   : > { %2504 = vst [vmem:[%s3836_s11 + $0x78] sm:$0xff] %v2488_v15  ;;  %v2486_v36 = vmax.f32 %v2470_v18, 0.0 }
 0x243   : > { %2502 = vst [vmem:[%s3836_s11 + $0x68] sm:$0xff] %v2486_v36 }
 0x244   : > { %3412 = shalt.err (!%p3409_p9)
}
 0x245   : > { %s3413_s5 = scalar_lea.hbm %s3869_s21, 2048  ;;  %s3417_s8 = scalar_lea.hbm %s3926_s4, 4096 }
 0x246   : > { %p3414_p12 = scmp.ne.s32.totalorder %s3869_s21, %s3413_s5  ;;  %p3418_p5 = scmp.lt.s32.totalorder %s3869_s21, %s3926_s4 }
 0x247   : > { %p3419_p3 = scmp.lt.s32.totalorder %s3417_s8, %s3413_s5 }
 0x248   : > { %p3415_p1 = pnand %p3414_p12, %p3933_p10 }
 0x249   : > { %p3420_p4 = por %p3419_p3, %p3418_p5 }
 0x24a   : > { %p3416_p2 = pneg %p3415_p1 }
 0x24c   : > { %p3421_p8 = pnand %p3420_p4, %p3416_p2 }
 0x24e   : > { %3424 = shalt.err (!%p3421_p8)
}
 0x24f   : > { %s3493_s11 = smov 128   ;;  %s3494_s6 = smov 8  }
 0x250   : > { %3186 = dma.vmem_to_hbm [thread:$0]  (%p3933_p10), %s3871_s12, 2048, %s3869_s21, %s3877_s22, %s3493_s11, %s3493_s11, %s3494_s6  }
 0x251 PF: > { %p3203_p11 = scmp.ge.s32.totalorder %s3483_s20, 2  ;;  %s2535_s13 = sand.u32 1, %s3463_s15  }
 0x252   : > { %p3934_p13 = scmp.ne.s32.totalorder %s3929_s27, 0  ;;  %s2536_s14 = scalar_lea.sflag [#allocation5], %s2535_s13 }
 0x254   : > { %p3196_p0 = pnand %p3203_p11, %p3934_p13 }
 0x256   : > { %p3197_p6 = pneg %p3196_p0 }
 0x258   : > { %3458 = dma.done.wait (%p3197_p6), %s2536_s14, 2048  }
 0x259   : > { %3460 = vsyncadd (%p3197_p6), %s2536_s14, 4294965248  ;;  %s19_s20 = sadd.s32 1, %s3483_s20   ;;  %s3935_s15 = smov %s3467_s16 }
 0x25a   : > { %p16_p7 = scmp.ge.s32.totalorder %s19_s20, 4   ;;  %s3936_s16 = smov %s3471_s17 }
 0x25b   : > { %s3937_s17 = smov %s3573_s28  ;;  %s3938_s18 = smov %s3479_s19 }
 0x25c   : > { %s3939_s19 = smov %s3941_s23  ;;  %18 = sbr.rel (!%p16_p7) target bundleno = 6 (0x6), region = 87 }
 0x261   :  { %2541 = vsyncpa [#allocation4], 1 }
 0x262   :  { %2543 = vsyncpa [#allocation4 + $0x1], 1 }
 0x263   :  { %2544 = vsyncpa [#allocation7], 1 }
 0x264   :  { %2545 = vsyncpa [#allocation5], 1 }
 0x265   :  { %2547 = vsyncpa [#allocation5 + $0x1], 1 }

</bundles_post_ra>
